<compile_context>
chip_gen: v7x
topology: tpu7x:2x2x1
jax: 0.10.0
libtpu: 0.0.40
codegen_flags: <defaults>
</compile_context>

<pallas_src>
import functools

import jax
import jax.numpy as jnp
from jax.experimental import pallas as pl
from jax.experimental.pallas import tpu as pltpu


def _bottleneck_kernel(x_ref, w_um_ref, w_ds_seg_ref, vec_ref, out_ref, *,
                       cenc_t, cin_t, k_sparse, eps):
    hi = jax.lax.Precision.HIGHEST

    x = x_ref[...]                                  # (B, Cin*T)
    w_um = w_um_ref[...]                            # (Cin*T, 2*Cenc*T)
    w_ds = w_ds_seg_ref[0:cenc_t, :]                # (Cenc*T, Cin*T) down+summary
    seg = w_ds_seg_ref[cenc_t:cenc_t + cin_t, :]    # (Cin*T, Cin*T) block-ones/(B*T)

    vec = vec_ref[...]                              # (4, 2*Cenc*T) packed vectors
    b_um = vec[0:1, :]                              # (1, 2*Cenc*T)
    b_ds = vec[1:2, :cin_t]                         # (1, Cin*T)
    gamma = vec[2:3, :cin_t]                        # (1, Cin*T)
    beta = vec[3:4, :cin_t]                         # (1, Cin*T)

    # Fused up/mask 1x1 convs: one MXU matmul in the flattened (c*T + t) layout.
    um = jnp.dot(x, w_um, precision=hi, preferred_element_type=jnp.float32) + b_um
    up = um[:, :cenc_t]                             # (B, Cenc*T) lane-dense
    mask = um[:, cenc_t:]                           # (B, Cenc*T) lane-dense

    # Softmax over the flattened Cenc*T lanes of each batch row
    # (== torch.softmax(mask.view(B, -1), -1)).
    m_max = jnp.max(mask, axis=-1, keepdims=True)
    e = jnp.exp(mask - m_max)
    sm = e / jnp.sum(e, axis=-1, keepdims=True)

    # Top-k sparsification per batch row: k rounds of max extraction find the
    # k-th largest value; threshold against it.  (Ties at the threshold are all
    # kept, a slight divergence from torch.topk which keeps exactly k.)
    thr = jnp.full((sm.shape[0], 1), jnp.inf, dtype=sm.dtype)
    for _ in range(k_sparse):                       # short static unroll (k=4)
        thr = jnp.max(jnp.where(sm < thr, sm, -jnp.inf), axis=-1, keepdims=True)
    sm = jnp.where(sm >= thr, sm, 0.0)

    # Gate.
    s = sm * up                                     # (B, Cenc*T)

    # Down 1x1 conv + (sum over T -> Linear(Cenc->Cin) -> broadcast over T),
    # all folded into one expanded-weight MXU matmul.
    y = jnp.dot(s, w_ds, precision=hi, preferred_element_type=jnp.float32) + b_ds

    # BatchNorm1d (training-mode batch statistics) in the flattened layout:
    # per-channel mean/var over (B, T), broadcast back across that channel's
    # T lanes via the pre-scaled block-ones segment matrix.
    mu = jnp.dot(jnp.sum(y, axis=0, keepdims=True), seg,
                 precision=hi, preferred_element_type=jnp.float32)    # (1, Cin*T)
    d = y - mu
    var = jnp.dot(jnp.sum(d * d, axis=0, keepdims=True), seg,
                  precision=hi, preferred_element_type=jnp.float32)   # (1, Cin*T)
    out = d * (gamma * jax.lax.rsqrt(var + eps)) + beta
    out_ref[...] = out.astype(out_ref.dtype)


@functools.partial(jax.jit, static_argnames=("k_sparse", "eps"))
def bottleneck_pallas(x, params, *, k_sparse, eps=1e-5):
    (w_up, b_up, w_mask, b_mask, w_sum, b_sum, w_down, b_down, gamma, beta) = params
    B, Cin, T = x.shape
    Cenc = w_up.shape[0]
    f32 = jnp.float32
    cin_t, cenc_t = Cin * T, Cenc * T

    eye_t = jnp.eye(T, dtype=f32)
    ones_tt = jnp.ones((T, T), dtype=f32)

    # ---- layout plumbing (all outside the kernel) --------------------------
    # Fused up+mask weight, kron-expanded so a plain (B,Cin*T)@(Cin*T,2*Cenc*T)
    # matmul realizes both 1x1 convs directly in the flattened (c*T+t) layout.
    w_um_big = jnp.kron(jnp.concatenate([w_up, w_mask], 0).T.astype(f32), eye_t)
    b_um_flat = jnp.repeat(jnp.concatenate([b_up, b_mask]).astype(f32), T)

    # Down conv + summary Linear fused into one expanded weight:
    #   y[b, i*T+t] = sum_{c,t'} s[b, c*T+t'] * (Wd[i,c]*I[t',t] + Ws[i,c])
    w_ds_big = (jnp.kron(w_down.T.astype(f32), eye_t)
                + jnp.kron(w_sum.T.astype(f32), ones_tt))             # (Cenc*T, Cin*T)
    b_ds_flat = jnp.repeat((b_down + b_sum).astype(f32), T)           # (Cin*T,)

    # Block-ones segment matrix (pre-scaled by 1/(B*T)) for the in-kernel BN:
    # turns per-channel (B,T) statistics into lane-dense matmul reductions.
    ch = jnp.arange(cin_t, dtype=jnp.int32) // T
    seg = (ch[:, None] == ch[None, :]).astype(f32) / float(B * T)     # (Cin*T, Cin*T)
    w_ds_seg = jnp.concatenate([w_ds_big, seg], axis=0)               # (Cenc*T+Cin*T, Cin*T)

    # Pack every small vector (biases, gamma, beta) into ONE slab -> one DMA.
    vec = jnp.zeros((4, 2 * cenc_t), f32)
    vec = vec.at[0, :].set(b_um_flat)
    vec = vec.at[1, :cin_t].set(b_ds_flat)
    vec = vec.at[2, :cin_t].set(jnp.repeat(gamma.astype(f32), T))
    vec = vec.at[3, :cin_t].set(jnp.repeat(beta.astype(f32), T))

    x_flat = x.astype(f32).reshape(B, cin_t)

    kernel = functools.partial(_bottleneck_kernel, cenc_t=cenc_t, cin_t=cin_t,
                               k_sparse=k_sparse, eps=eps)
    vmem = pl.BlockSpec(memory_space=pltpu.MemorySpace.VMEM)
    out_flat = pl.pallas_call(
        kernel,
        out_shape=jax.ShapeDtypeStruct((B, cin_t), f32),   # lane-dense output slab
        in_specs=[vmem, vmem, vmem, vmem],
        out_specs=vmem,
    )(x_flat, w_um_big, w_ds_seg, vec)
    return out_flat.reshape(B, Cin, T)


def bottleneck_ref(x, params, *, k_sparse, eps=1e-5):
    """Pure-JAX reference mirroring the PyTorch forward (training-mode BN)."""
    (w_up, b_up, w_mask, b_mask, w_sum, b_sum, w_down, b_down, gamma, beta) = params
    B = x.shape[0]
    up = jnp.einsum('oc,bct->bot', w_up, x) + b_up[None, :, None]
    mask = jnp.einsum('oc,bct->bot', w_mask, x) + b_mask[None, :, None]
    sm = jax.nn.softmax(mask.reshape(B, -1), axis=-1)
    vals, idx = jax.lax.top_k(sm, k_sparse)
    sm = jnp.zeros_like(sm).at[jnp.arange(B)[:, None], idx].set(vals)
    sm = sm.reshape(mask.shape)
    s = sm * up
    summary = jnp.sum(s, axis=-1)
    proj = summary @ w_sum.T + b_sum
    y = jnp.einsum('oc,bct->bot', w_down, s) + b_down[None, :, None] + proj[:, :, None]
    mu = jnp.mean(y, axis=(0, 2), keepdims=True)
    var = jnp.mean((y - mu) ** 2, axis=(0, 2), keepdims=True)
    y = (y - mu) / jnp.sqrt(var + eps)
    return y * gamma[None, :, None] + beta[None, :, None]


if __name__ == "__main__":
    in_channels = 4
    encoding_channels = 8
    k_sparse = 4
    B, T = 2, 16

    key = jax.random.PRNGKey(0)
    ks = jax.random.split(key, 9)
    x = jax.random.normal(ks[0], (B, in_channels, T), dtype=jnp.float32)

    # Deterministic synthetic parameters (conv kernels are 1x1 -> stored as 2-D).
    w_up = 0.3 * jax.random.normal(ks[1], (encoding_channels, in_channels), jnp.float32)
    b_up = 0.1 * jax.random.normal(ks[2], (encoding_channels,), jnp.float32)
    w_mask = 0.3 * jax.random.normal(ks[3], (encoding_channels, in_channels), jnp.float32)
    b_mask = 0.1 * jax.random.normal(ks[4], (encoding_channels,), jnp.float32)
    w_sum = 0.3 * jax.random.normal(ks[5], (in_channels, encoding_channels), jnp.float32)
    b_sum = 0.1 * jax.random.normal(ks[6], (in_channels,), jnp.float32)
    w_down = 0.3 * jax.random.normal(ks[7], (in_channels, encoding_channels), jnp.float32)
    b_down = 0.1 * jax.random.normal(ks[8], (in_channels,), jnp.float32)
    gamma = jnp.ones((in_channels,), jnp.float32)   # BatchNorm1d default affine init
    beta = jnp.zeros((in_channels,), jnp.float32)

    params = (w_up, b_up, w_mask, b_mask, w_sum, b_sum, w_down, b_down, gamma, beta)

    out = bottleneck_pallas(x, params, k_sparse=k_sparse)
    out = jax.block_until_ready(out)

    ref = bottleneck_ref(x, params, k_sparse=k_sparse)
    assert out.shape == (B, in_channels, T)
    assert jnp.allclose(out, ref, atol=2e-4, rtol=2e-4), (
        f"max abs diff: {jnp.max(jnp.abs(out - ref))}")

    print("KERNEL_OK")
</pallas_src>

<mosaic_0001>
module attributes {stable_mosaic.version = 11 : i64} {
  func.func @_bottleneck_kernel(%arg0: memref<2x64xf32, #tpu.memory_space<vmem>>, %arg1: memref<64x256xf32, #tpu.memory_space<vmem>>, %arg2: memref<192x64xf32, #tpu.memory_space<vmem>>, %arg3: memref<4x256xf32, #tpu.memory_space<vmem>>, %arg4: memref<2x64xf32, #tpu.memory_space<vmem>>) attributes {dimension_semantics = [], scalar_prefetch = 0 : i64, scratch_operands = 0 : i64, tpu.core_type = #tpu.core_type<tc>} {
    %c0 = arith.constant 0 : index
    %c0_0 = arith.constant 0 : index
    %0 = vector.load %arg0[%c0, %c0_0] : memref<2x64xf32, #tpu.memory_space<vmem>>, vector<2x64xf32>
    %c0_1 = arith.constant 0 : index
    %c0_2 = arith.constant 0 : index
    %1 = vector.load %arg1[%c0_1, %c0_2] : memref<64x256xf32, #tpu.memory_space<vmem>>, vector<64x256xf32>
    %c0_3 = arith.constant 0 : index
    %c0_4 = arith.constant 0 : index
    %2 = vector.load %arg2[%c0_3, %c0_4] : memref<192x64xf32, #tpu.memory_space<vmem>>, vector<128x64xf32>
    %c128 = arith.constant 128 : index
    %c0_5 = arith.constant 0 : index
    %3 = vector.load %arg2[%c128, %c0_5] : memref<192x64xf32, #tpu.memory_space<vmem>>, vector<64x64xf32>
    %c0_6 = arith.constant 0 : index
    %c0_7 = arith.constant 0 : index
    %4 = vector.load %arg3[%c0_6, %c0_7] : memref<4x256xf32, #tpu.memory_space<vmem>>, vector<4x256xf32>
    %5 = vector.extract_strided_slice %4 {offsets = [0, 0], sizes = [1, 256], strides = [1, 1]} : vector<4x256xf32> to vector<1x256xf32>
    %6 = vector.extract_strided_slice %4 {offsets = [1, 0], sizes = [1, 64], strides = [1, 1]} : vector<4x256xf32> to vector<1x64xf32>
    %7 = vector.extract_strided_slice %4 {offsets = [2, 0], sizes = [1, 64], strides = [1, 1]} : vector<4x256xf32> to vector<1x64xf32>
    %8 = vector.extract_strided_slice %4 {offsets = [3, 0], sizes = [1, 64], strides = [1, 1]} : vector<4x256xf32> to vector<1x64xf32>
    %cst = arith.constant dense<0.000000e+00> : vector<2x256xf32>
    %9 = tpu.matmul %0, %1, %cst {dimension_numbers = #tpu.dot_dimension_numbers<[1], [0], [0], [1], [0, 0, 1, 1], [], []>, precision = #tpu.contract_precision<fp32>} : vector<2x64xf32>, vector<64x256xf32>, vector<2x256xf32> -> vector<2x256xf32>
    %10 = vector.broadcast %5 : vector<1x256xf32> to vector<2x256xf32>
    %11 = arith.addf %9, %10 : vector<2x256xf32>
    %12 = vector.extract_strided_slice %11 {offsets = [0, 0], sizes = [2, 128], strides = [1, 1]} : vector<2x256xf32> to vector<2x128xf32>
    %13 = vector.extract_strided_slice %11 {offsets = [0, 128], sizes = [2, 128], strides = [1, 1]} : vector<2x256xf32> to vector<2x128xf32>
    %cst_8 = arith.constant dense<0xFF800000> : vector<2xf32>
    %14 = vector.multi_reduction <maximumf>, %13, %cst_8 [1] : vector<2x128xf32> to vector<2xf32>
    %15 = vector.shape_cast %14 : vector<2xf32> to vector<2x1xf32>
    %16 = vector.broadcast %15 : vector<2x1xf32> to vector<2x128xf32>
    %17 = arith.subf %13, %16 : vector<2x128xf32>
    %18 = math.exp %17 : vector<2x128xf32>
    %cst_9 = arith.constant dense<0.000000e+00> : vector<2xf32>
    %19 = vector.multi_reduction <add>, %18, %cst_9 [1] : vector<2x128xf32> to vector<2xf32>
    %20 = vector.shape_cast %19 : vector<2xf32> to vector<2x1xf32>
    %21 = vector.broadcast %20 : vector<2x1xf32> to vector<2x128xf32>
    %22 = arith.divf %18, %21 : vector<2x128xf32>
    %cst_10 = arith.constant 0x7F800000 : f32
    %23 = vector.broadcast %cst_10 : f32 to vector<2x1xf32>
    %24 = vector.broadcast %23 : vector<2x1xf32> to vector<2x128xf32>
    %25 = arith.cmpf olt, %22, %24 : vector<2x128xf32>
    %cst_11 = arith.constant 0xFF800000 : f32
    %26 = vector.broadcast %cst_11 : f32 to vector<2x128xf32>
    %27 = arith.select %25, %22, %26 : vector<2x128xi1>, vector<2x128xf32>
    %cst_12 = arith.constant dense<0xFF800000> : vector<2xf32>
    %28 = vector.multi_reduction <maximumf>, %27, %cst_12 [1] : vector<2x128xf32> to vector<2xf32>
    %29 = vector.shape_cast %28 : vector<2xf32> to vector<2x1xf32>
    %30 = vector.broadcast %29 : vector<2x1xf32> to vector<2x128xf32>
    %31 = arith.cmpf olt, %22, %30 : vector<2x128xf32>
    %cst_13 = arith.constant 0xFF800000 : f32
    %32 = vector.broadcast %cst_13 : f32 to vector<2x128xf32>
    %33 = arith.select %31, %22, %32 : vector<2x128xi1>, vector<2x128xf32>
    %cst_14 = arith.constant dense<0xFF800000> : vector<2xf32>
    %34 = vector.multi_reduction <maximumf>, %33, %cst_14 [1] : vector<2x128xf32> to vector<2xf32>
    %35 = vector.shape_cast %34 : vector<2xf32> to vector<2x1xf32>
    %36 = vector.broadcast %35 : vector<2x1xf32> to vector<2x128xf32>
    %37 = arith.cmpf olt, %22, %36 : vector<2x128xf32>
    %cst_15 = arith.constant 0xFF800000 : f32
    %38 = vector.broadcast %cst_15 : f32 to vector<2x128xf32>
    %39 = arith.select %37, %22, %38 : vector<2x128xi1>, vector<2x128xf32>
    %cst_16 = arith.constant dense<0xFF800000> : vector<2xf32>
    %40 = vector.multi_reduction <maximumf>, %39, %cst_16 [1] : vector<2x128xf32> to vector<2xf32>
    %41 = vector.shape_cast %40 : vector<2xf32> to vector<2x1xf32>
    %42 = vector.broadcast %41 : vector<2x1xf32> to vector<2x128xf32>
    %43 = arith.cmpf olt, %22, %42 : vector<2x128xf32>
    %cst_17 = arith.constant 0xFF800000 : f32
    %44 = vector.broadcast %cst_17 : f32 to vector<2x128xf32>
    %45 = arith.select %43, %22, %44 : vector<2x128xi1>, vector<2x128xf32>
    %cst_18 = arith.constant dense<0xFF800000> : vector<2xf32>
    %46 = vector.multi_reduction <maximumf>, %45, %cst_18 [1] : vector<2x128xf32> to vector<2xf32>
    %47 = vector.shape_cast %46 : vector<2xf32> to vector<2x1xf32>
    %48 = vector.broadcast %47 : vector<2x1xf32> to vector<2x128xf32>
    %49 = arith.cmpf oge, %22, %48 : vector<2x128xf32>
    %cst_19 = arith.constant 0.000000e+00 : f32
    %50 = vector.broadcast %cst_19 : f32 to vector<2x128xf32>
    %51 = arith.select %49, %22, %50 : vector<2x128xi1>, vector<2x128xf32>
    %52 = arith.mulf %51, %12 : vector<2x128xf32>
    %cst_20 = arith.constant dense<0.000000e+00> : vector<2x64xf32>
    %53 = tpu.matmul %52, %2, %cst_20 {dimension_numbers = #tpu.dot_dimension_numbers<[1], [0], [0], [1], [0, 0, 1, 1], [], []>, precision = #tpu.contract_precision<fp32>} : vector<2x128xf32>, vector<128x64xf32>, vector<2x64xf32> -> vector<2x64xf32>
    %54 = vector.broadcast %6 : vector<1x64xf32> to vector<2x64xf32>
    %55 = arith.addf %53, %54 : vector<2x64xf32>
    %cst_21 = arith.constant dense<0.000000e+00> : vector<64xf32>
    %56 = vector.multi_reduction <add>, %55, %cst_21 [0] : vector<2x64xf32> to vector<64xf32>
    %57 = vector.shape_cast %56 : vector<64xf32> to vector<1x64xf32>
    %cst_22 = arith.constant dense<0.000000e+00> : vector<1x64xf32>
    %58 = tpu.matmul %57, %3, %cst_22 {dimension_numbers = #tpu.dot_dimension_numbers<[1], [0], [0], [1], [0, 0, 1, 1], [], []>, precision = #tpu.contract_precision<fp32>} : vector<1x64xf32>, vector<64x64xf32>, vector<1x64xf32> -> vector<1x64xf32>
    %59 = vector.broadcast %58 : vector<1x64xf32> to vector<2x64xf32>
    %60 = arith.subf %55, %59 : vector<2x64xf32>
    %61 = arith.mulf %60, %60 : vector<2x64xf32>
    %cst_23 = arith.constant dense<0.000000e+00> : vector<64xf32>
    %62 = vector.multi_reduction <add>, %61, %cst_23 [0] : vector<2x64xf32> to vector<64xf32>
    %63 = vector.shape_cast %62 : vector<64xf32> to vector<1x64xf32>
    %cst_24 = arith.constant dense<0.000000e+00> : vector<1x64xf32>
    %64 = tpu.matmul %63, %3, %cst_24 {dimension_numbers = #tpu.dot_dimension_numbers<[1], [0], [0], [1], [0, 0, 1, 1], [], []>, precision = #tpu.contract_precision<fp32>} : vector<1x64xf32>, vector<64x64xf32>, vector<1x64xf32> -> vector<1x64xf32>
    %cst_25 = arith.constant 9.99999974E-6 : f32
    %65 = vector.broadcast %cst_25 : f32 to vector<1x64xf32>
    %66 = arith.addf %64, %65 : vector<1x64xf32>
    %67 = math.rsqrt %66 : vector<1x64xf32>
    %68 = arith.mulf %7, %67 : vector<1x64xf32>
    %69 = vector.broadcast %68 : vector<1x64xf32> to vector<2x64xf32>
    %70 = arith.mulf %60, %69 : vector<2x64xf32>
    %71 = vector.broadcast %8 : vector<1x64xf32> to vector<2x64xf32>
    %72 = arith.addf %70, %71 : vector<2x64xf32>
    %c0_26 = arith.constant 0 : index
    %c0_27 = arith.constant 0 : index
    %73 = vector.load %arg4[%c0_26, %c0_27] : memref<2x64xf32, #tpu.memory_space<vmem>>, vector<2x64xf32>
    tpu.vector_store %arg4[%c0_26, %c0_27], %72 {strides = array<i32>} : memref<2x64xf32, #tpu.memory_space<vmem>>, vector<2x64xf32>,
    return
  }
}

</mosaic_0001>

<bundles_post_ra>
// kernel: bottleneck_pallas.1
= control target key start
LH: loop header
LB: loop body
LE: loop exit
PB: predicated region body
PF: predicated region fallthrough
CT: control target
= control target key end

     0   :  { %v3616_v3 = vmov 0.0   ;;  %vm78_vm0 = vcmask 523264   ;;  %vm729_vm1 = vcmask 1041408   ;;  %vm3618_vm6 = vmmov 0   ;;  %s4372_s1 = inlined_call_operand.vmem [shape: f32[64,256], index: 1, kind: input, shape index: {}]   ;;  %s4373_s0 = inlined_call_operand.vmem [shape: f32[2,64], index: 0, kind: input, shape index: {}]   ;;  %s4374_s3 = inlined_call_operand.vmem [shape: f32[4,256], index: 3, kind: input, shape index: {}]   ;;  %s4375_s2 = inlined_call_operand.vmem [shape: f32[192,64], index: 2, kind: input, shape index: {}]   ;;  %s4376_s4 = inlined_call_operand.vmem [shape: f32[2,64], index: 4, kind: output, shape index: {}]  }
   0x1   :  { %v19_v0 = vld [vmem:[%s4372_s1 + $0x8] sm:$0xff]  ;;  %v21_v1 = vld [vmem:[%s4372_s1 + $0x18] sm:$0xff]  ;;  %v18_v2 = vld [vmem:[%s4372_s1] sm:$0xff]  ;;  %162 = vmatprep.mubr.f32.mxu1 %v3616_v3  ;;  %511 = vmatprep.mubr.f32.mxu0 %v3616_v3  ;;  %vm1409_vm8 = vcmask 517120  }
   0x2   :  { %v82_v4 = vand.u32 4294901760, %v19_v0  ;;  %v86_v5 = vand.u32 4294901760, %v21_v1  ;;  %v20_v6 = vld [vmem:[%s4372_s1 + $0x10] sm:$0xff]  ;;  %v84_v7 = vand.u32 4294901760, %v18_v2  ;;  %v23_v8 = vld [vmem:[%s4372_s1 + $0x28] sm:$0xff]  ;;  %v25_v9 = vld [vmem:[%s4372_s1 + $0x38] sm:$0xff] }
   0x3   :  { %v88_v10 = vand.u32 4294901760, %v20_v6  ;;  %v90_v11 = vand.u32 4294901760, %v23_v8  ;;  %v94_v12 = vand.u32 4294901760, %v25_v9  ;;  %v22_v13 = vld [vmem:[%s4372_s1 + $0x20] sm:$0xff]  ;;  %v24_v14 = vld [vmem:[%s4372_s1 + $0x30] sm:$0xff]  ;;  %v27_v15 = vld [vmem:[%s4372_s1 + $0x48] sm:$0xff] }
   0x4   :  { %v3673_v16 = vpack.c.bf16 %v86_v5, %v82_v4  ;;  %v3675_v17 = vsub.f32 %v19_v0, %v82_v4  ;;  %v3677_v18 = vsub.f32 %v21_v1, %v86_v5  ;;  %v29_v19 = vld [vmem:[%s4372_s1 + $0x58] sm:$0xff]  ;;  %v26_v20 = vld [vmem:[%s4372_s1 + $0x40] sm:$0xff]  ;;  %v28_v21 = vld [vmem:[%s4372_s1 + $0x50] sm:$0xff]  ;;  %v3690_v23 = vsub.f32 %v18_v2, %v84_v7 }
   0x5   :  { %v3688_v22 = vpack.c.bf16 %v88_v10, %v84_v7  ;;  %v3692_v24 = vsub.f32 %v20_v6, %v88_v10  ;;  %v3694_v25 = vpack.c.bf16 %v94_v12, %v90_v11  ;;  %v31_v26 = vld [vmem:[%s4372_s1 + $0x68] sm:$0xff]  ;;  %v33_v27 = vld [vmem:[%s4372_s1 + $0x78] sm:$0xff]  ;;  %v3704_v28 = vsub.f32 %v23_v8, %v90_v11  ;;  %v30_v40 = vld [vmem:[%s4372_s1 + $0x60] sm:$0xff] }
   0x6   :  { %3179 = vmatprep.subr.bf16.mxu1 %v3673_v16  ;;  %3227 = vmatprep.subr.bf16.mxu0 %v3673_v16  ;;  %v92_v29 = vand.u32 4294901760, %v22_v13  ;;  %v96_v30 = vand.u32 4294901760, %v24_v14  ;;  %v98_v31 = vand.u32 4294901760, %v27_v15  ;;  %v102_v32 = vand.u32 4294901760, %v29_v19  ;;  %v32_v41 = vld [vmem:[%s4372_s1 + $0x70] sm:$0xff] }
   0x7   :  { %3181 = vmatpush1.bf16.msra.mxu1 %v3688_v22  ;;  %3229 = vmatpush1.bf16.msra.mxu0 %v3688_v22  ;;  %v100_v33 = vand.u32 4294901760, %v26_v20  ;;  %v104_v34 = vand.u32 4294901760, %v28_v21  ;;  %v106_v35 = vand.u32 4294901760, %v31_v26  ;;  %v3709_v36 = vsub.f32 %v25_v9, %v94_v12  ;;  %v17_v46 = vld [vmem:[%s4373_s0] sm:$0x3] }
   0x8   :  { %3183 = vmatprep.subr.bf16.mxu1 %v3694_v25  ;;  %3231 = vmatprep.subr.bf16.mxu0 %v3694_v25  ;;  %v3712_v37 = vpack.c.bf16 %v96_v30, %v92_v29  ;;  %v3714_v38 = vsub.f32 %v22_v13, %v92_v29  ;;  %v110_v39 = vand.u32 4294901760, %v33_v27  ;;  %v3722_v42 = vsub.f32 %v24_v14, %v96_v30 }
   0x9   :  { %v3724_v43 = vpack.c.bf16 %v102_v32, %v98_v31  ;;  %v3726_v44 = vsub.f32 %v27_v15, %v98_v31  ;;  %v3728_v45 = vsub.f32 %v29_v19, %v102_v32  ;;  %v3733_v47 = vpack.c.bf16 %v104_v34, %v100_v33 }
   0xa   :  { %v3735_v48 = vsub.f32 %v26_v20, %v100_v33  ;;  %v3737_v49 = vsub.f32 %v28_v21, %v104_v34  ;;  %v3739_v50 = vpack.c.bf16 %v110_v39, %v106_v35  ;;  %v3743_v51 = vsub.f32 %v31_v26, %v106_v35 }
   0xb   :  { %3185 = vmatpush1.bf16.msra.mxu1 %v3712_v37  ;;  %3233 = vmatpush1.bf16.msra.mxu0 %v3712_v37  ;;  %v108_v52 = vand.u32 4294901760, %v30_v40  ;;  %v112_v53 = vand.u32 4294901760, %v32_v41  ;;  %v176_v54 = vand.u32 4294901760, %v3675_v17  ;;  %v188_v55 = vand.u32 4294901760, %v3677_v18 }
   0xc   :  { %3187 = vmatprep.subr.bf16.mxu1 %v3724_v43  ;;  %3235 = vmatprep.subr.bf16.mxu0 %v3724_v43  ;;  %v80_v56 = vsel %vm78_vm0, %v17_v46, 0  ;;  %v182_v57 = vand.u32 4294901760, %v3690_v23  ;;  %v194_v58 = vand.u32 4294901760, %v3692_v24  ;;  %v3752_v59 = vsub.f32 %v33_v27, %v110_v39 }
   0xd   :  { %v3754_v60 = vpack.c.bf16 %v112_v53, %v108_v52  ;;  %v3756_v61 = vsub.f32 %v30_v40, %v108_v52  ;;  %v177_v62 = vsub.f32 %v3675_v17, %v176_v54  ;;  %v3759_v63 = vsub.f32 %v32_v41, %v112_v53 }
   0xe   :  { %v189_v0 = vsub.f32 %v3677_v18, %v188_v55  ;;  %v3762_v1 = vand.u32 4294901760, %v80_v56  ;;  %v183_v2 = vsub.f32 %v3690_v23, %v182_v57  ;;  %v3242_v5 = vpack.c.bf16 %v188_v55, %v176_v54 }
   0xf   :  { %3189 = vmatpush1.bf16.msra.mxu1 %v3733_v47  ;;  %3237 = vmatpush1.bf16.msra.mxu0 %v3733_v47  ;;  %v178_v4 = vand.u32 4294901760, %v177_v62  ;;  %v195_v6 = vsub.f32 %v3692_v24, %v194_v58  ;;  %v200_v7 = vand.u32 4294901760, %v3704_v28  ;;  %v212_v11 = vand.u32 4294901760, %v3709_v36 }
  0x10   :  { %3191 = vmatprep.subr.bf16.mxu1 %v3739_v50  ;;  %3239 = vmatprep.subr.bf16.mxu0 %v3739_v50  ;;  %v190_v8 = vand.u32 4294901760, %v189_v0  ;;  %v3772_v9 = vsub.f32 %v80_v56, %v3762_v1  ;;  %v184_v10 = vand.u32 4294901760, %v183_v2  ;;  %v206_v14 = vand.u32 4294901760, %v3714_v38 }
  0x11   :  { %v196_v12 = vand.u32 4294901760, %v195_v6  ;;  %v201_v13 = vsub.f32 %v3704_v28, %v200_v7  ;;  %v218_v15 = vand.u32 4294901760, %v3722_v42  ;;  %v3244_v21 = vpack.c.bf16 %v194_v58, %v182_v57 }
  0x12   :  { %v3194_v19 = vpack.c.bf16 %v190_v8, %v178_v4  ;;  %v165_v20 = vand.u32 4294901760, %v3772_v9  ;;  %v213_v26 = vsub.f32 %v3709_v36, %v212_v11  ;;  %v3246_v29 = vpack.c.bf16 %v212_v11, %v200_v7 }
  0x13   :  { %3193 = vmatpush1.bf16.msra.mxu1 %v3754_v60  ;;  %3241 = vmatpush1.bf16.msra.mxu0 %v3754_v60  ;;  %v202_v27 = vand.u32 4294901760, %v201_v13  ;;  %v207_v30 = vsub.f32 %v3714_v38, %v206_v14  ;;  %v219_v31 = vsub.f32 %v3722_v42, %v218_v15  ;;  %v3196_v33 = vpack.c.bf16 %v196_v12, %v184_v10 }
  0x14   :  { %3195 = vmatprep.subr.bf16.mxu1 %v3194_v19  ;;  %3243 = vmatprep.subr.bf16.mxu0 %v3242_v5  ;;  %v166_v32 = vsub.f32 %v3772_v9, %v165_v20  ;;  %v214_v34 = vand.u32 4294901760, %v213_v26  ;;  %v224_v35 = vand.u32 4294901760, %v3726_v44  ;;  %v236_v41 = vand.u32 4294901760, %v3728_v45 }
  0x15   :  { %v208_v39 = vand.u32 4294901760, %v207_v30  ;;  %v220_v40 = vand.u32 4294901760, %v219_v31  ;;  %v230_v46 = vand.u32 4294901760, %v3735_v48  ;;  %v242_v55 = vand.u32 4294901760, %v3737_v49 }
  0x16   :  { %v167_v52 = vand.u32 4294901760, %v166_v32  ;;  %515 = vmatmul.mubr.f32.vlgmr.msra.gmra.mrb[0].mxu0 %v165_v20  ;;  %v3198_v53 = vpack.c.bf16 %v214_v34, %v202_v27  ;;  %v225_v54 = vsub.f32 %v3726_v44, %v224_v35  ;;  %v3248_v57 = vpack.c.bf16 %v218_v15, %v206_v14 }
  0x17   :  { %3245 = vmatpush1.bf16.msra.mxu0 %v3244_v21  ;;  %v3200_v56 = vpack.c.bf16 %v220_v40, %v208_v39  ;;  %v237_v58 = vsub.f32 %v3728_v45, %v236_v41  ;;  %v231_v62 = vsub.f32 %v3735_v48, %v230_v46  ;;  %v3250_v2 = vpack.c.bf16 %v236_v41, %v224_v35 }
  0x18   :  { %168 = vmatmul.mubr.f32.vlgmr.msra.gmra.mrb[0].mxu1 %v167_v52  ;;  %3247 = vmatprep.subr.bf16.mxu0 %v3246_v29  ;;  %v226_v0 = vand.u32 4294901760, %v225_v54  ;;  %v243_v4 = vsub.f32 %v3737_v49, %v242_v55  ;;  %v248_v5 = vand.u32 4294901760, %v3743_v51  ;;  %v260_v8 = vand.u32 4294901760, %v3752_v59 }
  0x19   :  { %3197 = vmatpush1.bf16.msra.mxu1 %v3196_v33  ;;  %v238_v6 = vand.u32 4294901760, %v237_v58  ;;  %v232_v7 = vand.u32 4294901760, %v231_v62  ;;  %v254_v10 = vand.u32 4294901760, %v3756_v61  ;;  %318 = vmatprep.mubr.f32.mxu1 %v3616_v3  ;;  %v266_v13 = vand.u32 4294901760, %v3759_v63 }
  0x1a   :  { %3199 = vmatprep.subr.bf16.mxu1 %v3198_v53  ;;  %v244_v11 = vand.u32 4294901760, %v243_v4  ;;  %v249_v12 = vsub.f32 %v3743_v51, %v248_v5  ;;  %633 = vmatprep.mubr.f32.mxu0 %v3616_v3  ;;  %v3252_v15 = vpack.c.bf16 %v242_v55, %v230_v46  ;;  %v261_v19 = vsub.f32 %v3752_v59, %v260_v8 }
  0x1b   :  { %3249 = vmatpush1.bf16.msra.mxu0 %v3248_v57  ;;  %v3202_v14 = vpack.c.bf16 %v238_v6, %v226_v0  ;;  %v255_v20 = vsub.f32 %v3756_v61, %v254_v10  ;;  %v3254_v26 = vpack.c.bf16 %v260_v8, %v248_v5  ;;  %v267_v27 = vsub.f32 %v3759_v63, %v266_v13  ;;  %v35_v8 = vld [vmem:[%s4375_s2 + $0x8] sm:$0xff] }
  0x1c   :  { %3251 = vmatprep.subr.bf16.mxu0 %v3250_v2  ;;  %v250_v21 = vand.u32 4294901760, %v249_v12  ;;  %v3204_v29 = vpack.c.bf16 %v244_v11, %v232_v7  ;;  %v262_v30 = vand.u32 4294901760, %v261_v19  ;;  %v3256_v34 = vpack.c.bf16 %v266_v13, %v254_v10  ;;  %v34_v7 = vld [vmem:[%s4375_s2] sm:$0xff]  ;;  %v36_v10 = vld [vmem:[%s4375_s2 + $0x10] sm:$0xff]  ;;  %v37_v13 = vld [vmem:[%s4375_s2 + $0x18] sm:$0xff] }
  0x1d   :  { %3201 = vmatpush1.bf16.msra.mxu1 %v3200_v56  ;;  %v256_v31 = vand.u32 4294901760, %v255_v20  ;;  %v268_v32 = vand.u32 4294901760, %v267_v27  ;;  %v3210_v39 = vpack.c.bf16 %v3677_v18, %v3675_v17  ;;  %v3212_v40 = vpack.c.bf16 %v3692_v24, %v3690_v23  ;;  %v39_v19 = vld [vmem:[%s4375_s2 + $0x28] sm:$0xff]  ;;  %v40_v27 = vld [vmem:[%s4375_s2 + $0x30] sm:$0xff] }
  0x1e   :  { %3203 = vmatprep.subr.bf16.mxu1 %v3202_v14  ;;  %v3206_v33 = vpack.c.bf16 %v262_v30, %v250_v21  ;;  %v3214_v41 = vpack.c.bf16 %v3709_v36, %v3704_v28  ;;  %v3218_v17 = vpack.c.bf16 %v3728_v45, %v3726_v44  ;;  %v3220_v18 = vpack.c.bf16 %v3737_v49, %v3735_v48  ;;  %v3841_v36 = vld [vmem:[%s4374_s3] sm:$0xff] }
  0x1f   :  { %3253 = vmatpush1.bf16.msra.mxu0 %v3252_v15  ;;  %v3208_v35 = vpack.c.bf16 %v268_v32, %v256_v31  ;;  %v3224_v23 = vpack.c.bf16 %v3759_v63, %v3756_v61  ;;  %v60_v24 = vlaneseq  ;;  %v3617_v6 = vmov 0.0|0.0   ;;  %v38_v15 = vld [vmem:[%s4375_s2 + $0x20] sm:$0xff] }
  0x20   :  { %3255 = vmatprep.subr.bf16.mxu0 %v3254_v26  ;;  %v769_v11 = vand.u32 4294901760, %v34_v7  ;;  %v772_v12 = vand.u32 4294901760, %v35_v8  ;;  %v775_v14 = vand.u32 4294901760, %v36_v10  ;;  %v778_v20 = vand.u32 4294901760, %v37_v13  ;;  %v42_v30 = vld [vmem:[%s4375_s2 + $0x40] sm:$0xff] }
  0x21   :  { %3205 = vmatpush1.bf16.msra.mxu1 %v3204_v29  ;;  %v781_v21 = vand.u32 4294901760, %v38_v15  ;;  %v784_v26 = vand.u32 4294901760, %v39_v19  ;;  %v41_v29 = vld [vmem:[%s4375_s2 + $0x38] sm:$0xff] }
  0x22   :  { %3207 = vmatprep.subr.bf16.mxu1 %v3206_v33  ;;  %v3893_v31 = vpack.c.bf16 %v772_v12, %v769_v11  ;;  %v3895_v32 = vsub.f32 %v34_v7, %v769_v11  ;;  %v3897_v33 = vsub.f32 %v35_v8, %v772_v12 }
  0x23   :  { %3257 = vmatpush1.bf16.msra.mxu0 %v3256_v34  ;;  %v3899_v34 = vsub.f32 %v36_v10, %v775_v14 }
  0x24   :  { %3259 = vmatprep.subr.bf16.mxu0 %v3673_v16  ;;  %v3216_v16 = vpack.c.bf16 %v3722_v42, %v3714_v38 }
  0x25   :  { %3209 = vmatpush1.bf16.msra.mxu1 %v3208_v35  ;;  %v43_v35 = vld [vmem:[%s4375_s2 + $0x48] sm:$0xff] }
  0x26   :  { %3211 = vmatprep.subr.bf16.mxu1 %v3210_v39  ;;  %635 = vmatmul.mubr.f32.vlgmr.msra.gmra.mrb[0].mxu0 %v3762_v1  ;;  %v3904_v39 = vpack.c.bf16 %v778_v20, %v775_v14  ;;  %v876_v14 = vand.u32 4294901760, %v3899_v34 }
  0x27   :  { %3261 = vmatpush1.bf16.msra.mxu0 %v3688_v22  ;;  %721 = vmatprep.mubr.f32.mxu0 %v3616_v3  ;;  %v3222_v22 = vpack.c.bf16 %v3752_v59, %v3743_v51 }
  0x28   :  { %320 = vmatmul.mubr.f32.vlgmr.msra.gmra.mrb[0].mxu1 %v3762_v1  ;;  %3263 = vmatprep.subr.bf16.mxu0 %v3694_v25  ;;  %v3833_v25 = vshrl.u32 %v60_v24, 7 }
  0x29   :  { %3213 = vmatpush1.bf16.msra.mxu1 %v3212_v40  ;;  %422 = vmatprep.mubr.f32.mxu1 %v3616_v3  ;;  %v3906_v40 = vsub.f32 %v37_v13, %v778_v20 }
  0x2a   :  { %3215 = vmatprep.subr.bf16.mxu1 %v3214_v41  ;;  %v3836_v28 = vsub.s32 0, %v3833_v25  ;;  %v3908_v41 = vsub.f32 %v38_v15, %v781_v21 }
  0x2b   :  { %3265 = vmatpush1.bf16.msra.mxu0 %v3712_v37  ;;  %v66_v37 = vsub.s32 4, %v3833_v25  ;;  %v883_v15 = vand.u32 4294901760, %v3906_v40 }
  0x2c   :  { %3267 = vmatprep.subr.bf16.mxu0 %v3724_v43  ;;  %v63_v38 = vrot.slane %v3841_v36, %v3836_v28 }
  0x2d   :  { %3217 = vmatpush1.bf16.msra.mxu1 %v3216_v16  ;;  %v67_v42 = vrot.slane %v3841_v36, %v66_v37  ;;  %v3911_v16 = vsub.f32 %v39_v19, %v784_v26 }
  0x2e   :  { %3219 = vmatprep.subr.bf16.mxu1 %v3218_v17  ;;  %v73_v43 = vrot.slane %v63_v38, %v3836_v28  ;;  %v787_v17 = vand.u32 4294901760, %v40_v27 }
  0x2f   :  { %3269 = vmatpush1.bf16.msra.mxu0 %v3733_v47  ;;  %v77_v45 = vrot.slane %v67_v42, %v3836_v28 }
  0x30   :  { %3271 = vmatprep.subr.bf16.mxu0 %v3739_v50  ;;  %v3914_v24 = vsub.f32 %v40_v27, %v787_v17 }
  0x31   :  { %3221 = vmatpush1.bf16.msra.mxu1 %v3220_v18  ;;  %v790_v18 = vand.u32 4294901760, %v41_v29 }
  0x32   :  { %3223 = vmatprep.subr.bf16.mxu1 %v3222_v22  ;;  %v793_v22 = vand.u32 4294901760, %v42_v30 }
  0x33   :  { %3273 = vmatpush1.bf16.msra.mxu0 %v3754_v60  ;;  %v3916_v37 = vsub.f32 %v41_v29, %v790_v18 }
  0x34   :  { %3418 = vmatprep.subr.bf16.mxu0 %v3617_v6  ;;  %v3918_v38 = vsub.f32 %v42_v30, %v793_v22 }
  0x35   :  { %3225 = vmatpush1.bf16.msra.mxu1 %v3224_v23  ;;  %v796_v23 = vand.u32 4294901760, %v43_v35 }
  0x36   :  { %723 = vmatmul.mubr.f32.vlgmr.msra.gmra.mrb[0].mxu0 %v3762_v1  ;;  %3274 = vmatprep.subr.bf16.mxu1 %v3617_v6 }
  0x37   :  { %v3920_v42 = vsub.f32 %v43_v35, %v796_v23  ;;  %2966 = vmatprep.mubr.msk.f32.mxu0 %vm3618_vm6, %v3616_v3  ;;  %v890_v35 = vand.u32 4294901760, %v3908_v41 }
  0x38   :  { %425 = vmatmul.mubr.f32.vlgmr.msra.gmra.mrb[0].mxu1 %v3772_v9 }
  0x39   :  { %3276 = vmatpush3.bf16.msra.mxu1 %v3893_v31  ;;  %2772 = vmatprep.mubr.msk.f32.mxu1 %vm3618_vm6, %v3616_v3 }
  0x3a   :  { %3277 = vmatprep.subr.bf16.mxu1 %v3617_v6 }
  0x3d   :  { %3279 = vmatpush3.bf16.msra.mxu1 %v3904_v39 }
  0x3e   :  { %3280 = vmatprep.subr.bf16.mxu1 %v3617_v6 }
 0x109   :  { %v724_v44 = vpop.f32.mrb[0].mxu0 }
 0x10a   :  { %v726_v47 = vpop.f32.mrb[1].mxu0 }
 0x10b   :  { %v426_v48 = vpop.f32.mrb[0].mxu1 }
 0x10c   :  { %v3562_v49 = vadd.f32 %v426_v48, %v73_v43  ;;  %v428_v50 = vpop.f32.mrb[1].mxu1  ;;  %v3923_v43 = vpack.c.bf16 %v784_v26, %v781_v21  ;;  %v877_v21 = vsub.f32 %v3899_v34, %v876_v14  ;;  %v884_v26 = vsub.f32 %v3906_v40, %v883_v15 }
 0x10d   :  { %v3564_v51 = vadd.f32 %v428_v50, %v77_v45  ;;  %v3931_v45 = vpack.c.bf16 %v796_v23, %v793_v22  ;;  %v44_v50 = vld [vmem:[%s4375_s2 + $0x50] sm:$0xff]  ;;  %v891_v22 = vsub.f32 %v3908_v41, %v890_v35 }
 0x10e   :  { %v3849_v59 = vadd.f32 %v3562_v49, %v724_v44  ;;  %3282 = vmatpush3.bf16.msra.mxu1 %v3923_v43  ;;  %v3927_v44 = vpack.c.bf16 %v790_v18, %v787_v17  ;;  %v878_v29 = vand.u32 4294901760, %v877_v21  ;;  %v885_v30 = vand.u32 4294901760, %v884_v26 }
 0x10f   :  { %v3565_v60 = vadd.f32 %v3564_v51, %v726_v47  ;;  %3283 = vmatprep.subr.bf16.mxu1 %v3617_v6  ;;  %v45_v51 = vld [vmem:[%s4375_s2 + $0x58] sm:$0xff]  ;;  %v897_v17 = vand.u32 4294901760, %v3911_v16 }
 0x110   :  { %v3302_v18 = vpack.c.bf16 %v885_v30, %v878_v29 }
 0x111   :  { %v730_v61 = vsel %vm729_vm1, %v3565_v60, -inf  ;;  %v898_v23 = vsub.f32 %v3911_v16, %v897_v17 }
 0x112   :  { %731 = vmax.xlane.f32.xlu0 %v730_v61  ;;  %3285 = vmatpush3.bf16.msra.mxu1 %v3927_v44  ;;  %v802_v61 = vand.u32 4294901760, %v45_v51 }
 0x113   :  { %3286 = vmatprep.subr.bf16.mxu1 %v3617_v6 }
 0x116   :  { %3288 = vmatpush3.bf16.msra.mxu1 %v3931_v45 }
 0x117   :  { %3289 = vmatprep.subr.bf16.mxu1 %v3617_v6 }
 0x19f   :  { %v732_v63 = vpop.xlane.xlu0 %731 }
 0x1a0   :  { %v733_v1 = vsub.f32 %v3565_v60, %v732_v63  ;;  %v799_v60 = vand.u32 4294901760, %v44_v50 }
 0x1a2   :  { %v734_v9 = vmul.f32 1.442695, %v733_v1  ;;  %v3945_v63 = vpack.c.bf16 %v802_v61, %v799_v60  ;;  %v46_v1 = vld [vmem:[%s4375_s2 + $0x60] sm:$0xff] }
 0x1a4   :  { %3609 = vpow2.f32 %v734_v9  ;;  %v47_v9 = vld [vmem:[%s4375_s2 + $0x68] sm:$0xff]  ;;  %3291 = vmatpush3.bf16.msra.mxu1 %v3945_v63 }
 0x1a5   :  { %3292 = vmatprep.subr.bf16.mxu1 %v3617_v6 }
 0x1ae   :  { %v3610_v46 = vpop.eup %3609 }
 0x1af   :  { %v736_v52 = vsel %vm729_vm1, %v3610_v46, 0.0 }
 0x1b0   :  { %737 = vadd.xlane.f32.xlu0 %v736_v52  ;;  %v808_v52 = vand.u32 4294901760, %v47_v9 }
 0x1b2   :  { %v3973_v7 = vsub.f32 %v47_v9, %v808_v52 }
 0x23d   :  { %v738_v53 = vpop.xlane.xlu0 %737 }
 0x23e   :  { %3611 = vrcp.f32 %v738_v53 }
 0x248   :  { %v3612_v54 = vpop.eup %3611 }
 0x249   :  { %v3853_v55 = vmul.f32 %v3612_v54, %v3610_v46  ;;  %v805_v46 = vand.u32 4294901760, %v46_v1  ;;  %v48_v54 = vld [vmem:[%s4375_s2 + $0x70] sm:$0xff] }
 0x24b   :  { %vm741_vm2 = vcmp.lt.f32.partialorder %v3853_v55, inf  ;;  %v3955_v53 = vpack.c.bf16 %v808_v52, %v805_v46  ;;  %v4383_v52 = vand.u32 4294901760, %v3920_v42 }
 0x24c   :  { %v742_v56 = vsel %vm741_vm2, %v3853_v55, -inf }
 0x24d   :  { %v743_v57 = vsel %vm729_vm1, %v742_v56, -inf  ;;  %v49_v56 = vld [vmem:[%s4375_s2 + $0x78] sm:$0xff]  ;;  %3294 = vmatpush3.bf16.msra.mxu1 %v3955_v53 }
 0x24e   :  { %744 = vmax.xlane.f32.xlu1 %v743_v57  ;;  %v811_v57 = vand.u32 4294901760, %v48_v54  ;;  %3295 = vmatprep.subr.bf16.mxu1 %v3617_v6 }
 0x250   :  { %v3977_v10 = vsub.f32 %v48_v54, %v811_v57 }
 0x2db   :  { %v745_v58 = vpop.xlane.xlu1 %744 }
 0x2dc   :  { %vm746_vm3 = vcmp.lt.f32.partialorder %v3853_v55, %v745_v58  ;;  %v814_v58 = vand.u32 4294901760, %v49_v56 }
 0x2dd   :  { %v747_v62 = vsel %vm746_vm3, %v3853_v55, -inf }
 0x2de   :  { %v748_v0 = vsel %vm729_vm1, %v747_v62, -inf  ;;  %v862_v62 = vand.u32 4294901760, %v3895_v32  ;;  %v3975_v8 = vpack.c.bf16 %v814_v58, %v811_v57  ;;  %v3979_v11 = vsub.f32 %v49_v56, %v814_v58 }
 0x2df   :  { %749 = vmax.xlane.f32.xlu1 %v748_v0  ;;  %v869_v0 = vand.u32 4294901760, %v3897_v33  ;;  %v926_v57 = vsub.f32 %v3920_v42, %v4383_v52 }
 0x2e0   :  { %v863_v12 = vsub.f32 %v3895_v32, %v862_v62  ;;  %3297 = vmatpush3.bf16.msra.mxu1 %v3975_v8 }
 0x2e1   :  { %v870_v13 = vsub.f32 %v3897_v33, %v869_v0  ;;  %3298 = vmatprep.subr.bf16.mxu1 %v3617_v6 }
 0x2e2   :  { %v864_v19 = vand.u32 4294901760, %v863_v12  ;;  %v927_v12 = vand.u32 4294901760, %v926_v57 }
 0x2e3   :  { %v871_v20 = vand.u32 4294901760, %v870_v13 }
 0x2e5   :  { %v4001_v27 = vpack.c.bf16 %v871_v20, %v864_v19 }
 0x36c   :  { %v750_v2 = vpop.xlane.xlu1 %749 }
 0x36d   :  { %vm751_vm4 = vcmp.lt.f32.partialorder %v3853_v55, %v750_v2  ;;  %v3967_v2 = vsub.f32 %v44_v50, %v799_v60  ;;  %v911_v50 = vand.u32 4294901760, %v3916_v37 }
 0x36e   :  { %v752_v4 = vsel %vm751_vm4, %v3853_v55, -inf }
 0x36f   :  { %v753_v5 = vsel %vm729_vm1, %v752_v4, -inf  ;;  %v3969_v4 = vsub.f32 %v45_v51, %v802_v61  ;;  %v912_v61 = vsub.f32 %v3916_v37, %v911_v50  ;;  %v4382_v13 = vand.u32 4294901760, %v3967_v2 }
 0x370   :  { %754 = vmax.xlane.f32.xlu0 %v753_v5  ;;  %v3971_v5 = vsub.f32 %v46_v1, %v805_v46  ;;  %v918_v46 = vand.u32 4294901760, %v3918_v38 }
 0x371   :  { %v913_v9 = vand.u32 4294901760, %v912_v61  ;;  %v4381_v19 = vand.u32 4294901760, %v3969_v4  ;;  %v933_v21 = vsub.f32 %v3967_v2, %v4382_v13 }
 0x372   :  { %v919_v56 = vsub.f32 %v3918_v38, %v918_v46 }
 0x373   :  { %v940_v26 = vsub.f32 %v3969_v4, %v4381_v19  ;;  %v934_v29 = vand.u32 4294901760, %v933_v21 }
 0x374   :  { %v920_v58 = vand.u32 4294901760, %v919_v56  ;;  %v4377_v56 = vand.u32 4294901760, %v3979_v11 }
 0x375   :  { %v941_v30 = vand.u32 4294901760, %v940_v26 }
 0x376   :  { %v3311_v20 = vpack.c.bf16 %v927_v12, %v920_v58  ;;  %v968_v12 = vsub.f32 %v3979_v11, %v4377_v56 }
 0x378   :  { %v969_v26 = vand.u32 4294901760, %v968_v12  ;;  %v3341_v12 = vpack.c.bf16 %v3973_v7, %v3971_v5 }
 0x3fd   :  { %v755_v47 = vpop.xlane.xlu0 %754 }
 0x3fe   :  { %vm756_vm5 = vcmp.lt.f32.partialorder %v3853_v55, %v755_v47  ;;  %v892_v47 = vand.u32 4294901760, %v891_v22  ;;  %v4380_v22 = vand.u32 4294901760, %v3971_v5 }
 0x3ff   :  { %v757_v48 = vsel %vm756_vm5, %v3853_v55, -inf }
 0x400   :  { %v758_v49 = vsel %vm729_vm1, %v757_v48, -inf  ;;  %v899_v48 = vand.u32 4294901760, %v898_v23  ;;  %v4379_v23 = vand.u32 4294901760, %v3973_v7 }
 0x401   :  { %759 = vmax.xlane.f32.xlu1 %v758_v49  ;;  %v904_v49 = vand.u32 4294901760, %v3914_v24 }
 0x402   :  { %v3305_v51 = vpack.c.bf16 %v899_v48, %v892_v47  ;;  %v3314_v47 = vpack.c.bf16 %v941_v30, %v934_v29  ;;  %v947_v48 = vsub.f32 %v3971_v5, %v4380_v22  ;;  %v3323_v30 = vpack.c.bf16 %v3897_v33, %v3895_v32 }
 0x403   :  { %v905_v60 = vsub.f32 %v3914_v24, %v904_v49  ;;  %v3377_v32 = vpack.c.bf16 %v897_v17, %v890_v35  ;;  %v3380_v33 = vpack.c.bf16 %v911_v50, %v904_v49  ;;  %v56_v17 = vld [vmem:[%s4375_s2 + $0xb0] sm:$0xff] }
 0x404   :  { %v948_v61 = vand.u32 4294901760, %v947_v48  ;;  %v3326_v48 = vpack.c.bf16 %v3906_v40, %v3899_v34  ;;  %v4384_v34 = vand.u32 4294901760, %v3920_v42  ;;  %v1439_v49 = vand.u32 4294901760, %v56_v17 }
 0x405   :  { %v906_v1 = vand.u32 4294901760, %v905_v60  ;;  %v954_v60 = vsub.f32 %v3973_v7, %v4379_v23 }
 0x406   :  { %v3383_v40 = vpack.c.bf16 %v4384_v34, %v918_v46 }
 0x407   :  { %v3308_v54 = vpack.c.bf16 %v913_v9, %v906_v1  ;;  %v955_v1 = vand.u32 4294901760, %v954_v60  ;;  %v4378_v9 = vand.u32 4294901760, %v3977_v10  ;;  %v3329_v60 = vpack.c.bf16 %v3911_v16, %v3908_v41 }
 0x408   :  { %v4385_v41 = vand.u32 4294901760, %v3967_v2  ;;  %v4386_v16 = vand.u32 4294901760, %v3969_v4 }
 0x409   :  { %v3317_v57 = vpack.c.bf16 %v955_v1, %v948_v61  ;;  %v961_v58 = vsub.f32 %v3977_v10, %v4378_v9  ;;  %v3332_v61 = vpack.c.bf16 %v3916_v37, %v3914_v24  ;;  %v3335_v1 = vpack.c.bf16 %v3920_v42, %v3918_v38 }
 0x40a   :  { %v4387_v24 = vand.u32 4294901760, %v3971_v5  ;;  %v4388_v37 = vand.u32 4294901760, %v3973_v7  ;;  %v4389_v38 = vand.u32 4294901760, %v3977_v10  ;;  %v4390_v42 = vand.u32 4294901760, %v3979_v11  ;;  %v54_v7 = vld [vmem:[%s4375_s2 + $0xa0] sm:$0xff] }
 0x40b   :  { %v962_v21 = vand.u32 4294901760, %v961_v58  ;;  %v3338_v58 = vpack.c.bf16 %v3969_v4, %v3967_v2 }
 0x40d   :  { %v3320_v29 = vpack.c.bf16 %v969_v26, %v962_v21  ;;  %v3344_v21 = vpack.c.bf16 %v3979_v11, %v3977_v10  ;;  %v1433_v10 = vand.u32 4294901760, %v54_v7 }
 0x48e   :  { %v760_v26 = vpop.xlane.xlu1 %759 }
 0x48f   :  { %vm761_vm7 = vcmp.ge.f32.partialorder %v3853_v55, %v760_v26 }
 0x490   :  { %v762_v56 = vsel %vm761_vm7, %v3853_v55, 0.0  ;;  %v3374_v55 = vpack.c.bf16 %v883_v15, %v876_v14  ;;  %v3392_v14 = vpack.c.bf16 %v4390_v42, %v4389_v38 }
 0x491   :  { %v763_v9 = vmul.f32 %v3849_v59, %v762_v56  ;;  %v3371_v59 = vpack.c.bf16 %v869_v0, %v862_v62  ;;  %v3386_v62 = vpack.c.bf16 %v4386_v16, %v4385_v41  ;;  %v3389_v0 = vpack.c.bf16 %v4388_v37, %v4387_v24 }
 0x493   :  { %v4070_v23 = vand.u32 4294901760, %v763_v9 }
 0x495   :  { %v850_v22 = vsub.f32 %v763_v9, %v4070_v23 }
 0x497   :  { %v851_v19 = vand.u32 4294901760, %v850_v22 }
 0x499   :  { %v852_v13 = vsub.f32 %v850_v22, %v851_v19 }
 0x49b   :  { %v853_v52 = vand.u32 4294901760, %v852_v13 }
 0x49d   :  { %2773 = vmatmul.mubr.f32.vlgmr.msra.gmra.mrb[2].mxu1 %v853_v52 }
 0x49e   :  { %3300 = vmatpush3.bf16.msra.mxu1 %v4001_v27  ;;  %2807 = vmatprep.mubr.msk.f32.mxu1 %vm3618_vm6, %v3616_v3 }
 0x49f   :  { %3301 = vmatprep.subr.bf16.mxu1 %v3617_v6 }
 0x4a2   :  { %3303 = vmatpush3.bf16.msra.mxu1 %v3302_v18  ;;  %v57_v18 = vld [vmem:[%s4375_s2 + $0xb8] sm:$0xff] }
 0x4a3   :  { %3304 = vmatprep.subr.bf16.mxu1 %v3617_v6  ;;  %v1442_v50 = vand.u32 4294901760, %v57_v18 }
 0x4a5   :  { %v4210_v52 = vpack.c.bf16 %v1442_v50, %v1439_v49 }
 0x4a6   :  { %3306 = vmatpush3.bf16.msra.mxu1 %v3305_v51 }
 0x4a7   :  { %3307 = vmatprep.subr.bf16.mxu1 %v3617_v6 }
 0x4aa   :  { %3309 = vmatpush3.bf16.msra.mxu1 %v3308_v54 }
 0x4ab   :  { %3310 = vmatprep.subr.bf16.mxu1 %v3617_v6 }
 0x4ae   :  { %3312 = vmatpush3.bf16.msra.mxu1 %v3311_v20 }
 0x4af   :  { %3313 = vmatprep.subr.bf16.mxu1 %v3617_v6 }
 0x4b2   :  { %3315 = vmatpush3.bf16.msra.mxu1 %v3314_v47 }
 0x4b3   :  { %3316 = vmatprep.subr.bf16.mxu1 %v3617_v6 }
 0x4b6   :  { %3318 = vmatpush3.bf16.msra.mxu1 %v3317_v57 }
 0x4b7   :  { %3319 = vmatprep.subr.bf16.mxu1 %v3617_v6 }
 0x4ba   :  { %3321 = vmatpush3.bf16.msra.mxu1 %v3320_v29 }
 0x4bb   :  { %3322 = vmatprep.subr.bf16.mxu1 %v3617_v6 }
 0x4bd   :  { %2808 = vmatmul.mubr.f32.vlgmr.msra.gmra.mrb[2].mxu1 %v4070_v23 }
 0x4be   :  { %3324 = vmatpush3.bf16.msra.mxu1 %v3323_v30  ;;  %2842 = vmatprep.mubr.msk.f32.mxu1 %vm3618_vm6, %v3616_v3  ;;  %v1533_v30 = vsub.f32 %v54_v7, %v1433_v10 }
 0x4bf   :  { %3325 = vmatprep.subr.bf16.mxu1 %v3617_v6 }
 0x4c2   :  { %3327 = vmatpush3.bf16.msra.mxu1 %v3326_v48 }
 0x4c3   :  { %3328 = vmatprep.subr.bf16.mxu1 %v3617_v6 }
 0x4c6   :  { %3330 = vmatpush3.bf16.msra.mxu1 %v3329_v60 }
 0x4c7   :  { %3331 = vmatprep.subr.bf16.mxu1 %v3617_v6 }
 0x4ca   :  { %3333 = vmatpush3.bf16.msra.mxu1 %v3332_v61 }
 0x4cb   :  { %3334 = vmatprep.subr.bf16.mxu1 %v3617_v6 }
 0x4ce   :  { %3336 = vmatpush3.bf16.msra.mxu1 %v3335_v1  ;;  %v1534_v1 = vand.u32 4294901760, %v1533_v30 }
 0x4cf   :  { %3337 = vmatprep.subr.bf16.mxu1 %v3617_v6 }
 0x4d2   :  { %3339 = vmatpush3.bf16.msra.mxu1 %v3338_v58 }
 0x4d3   :  { %3340 = vmatprep.subr.bf16.mxu1 %v3617_v6 }
 0x4d6   :  { %3342 = vmatpush3.bf16.msra.mxu1 %v3341_v12 }
 0x4d7   :  { %3343 = vmatprep.subr.bf16.mxu1 %v3617_v6 }
 0x4da   :  { %3345 = vmatpush3.bf16.msra.mxu1 %v3344_v21  ;;  %v1535_v21 = vsub.f32 %v1533_v30, %v1534_v1 }
 0x4db   :  { %3346 = vmatprep.subr.bf16.mxu1 %v3617_v6 }
 0x4dd   :  { %2843 = vmatmul.mubr.f32.vlgmr.msra.gmra.mrb[2].mxu1 %v850_v22 }
 0x4de   :  { %3348 = vmatpush3.bf16.msra.mxu1 %v3893_v31  ;;  %2877 = vmatprep.mubr.msk.f32.mxu1 %vm3618_vm6, %v3616_v3 }
 0x4df   :  { %3349 = vmatprep.subr.bf16.mxu1 %v3617_v6 }
 0x4e2   :  { %3351 = vmatpush3.bf16.msra.mxu1 %v3904_v39 }
 0x4e3   :  { %3352 = vmatprep.subr.bf16.mxu1 %v3617_v6 }
 0x4e6   :  { %3354 = vmatpush3.bf16.msra.mxu1 %v3923_v43 }
 0x4e7   :  { %3355 = vmatprep.subr.bf16.mxu1 %v3617_v6 }
 0x4ea   :  { %3357 = vmatpush3.bf16.msra.mxu1 %v3927_v44 }
 0x4eb   :  { %3358 = vmatprep.subr.bf16.mxu1 %v3617_v6 }
 0x4ee   :  { %3360 = vmatpush3.bf16.msra.mxu1 %v3931_v45 }
 0x4ef   :  { %3361 = vmatprep.subr.bf16.mxu1 %v3617_v6 }
 0x4f2   :  { %3363 = vmatpush3.bf16.msra.mxu1 %v3945_v63 }
 0x4f3   :  { %3364 = vmatprep.subr.bf16.mxu1 %v3617_v6 }
 0x4f6   :  { %3366 = vmatpush3.bf16.msra.mxu1 %v3955_v53 }
 0x4f7   :  { %3367 = vmatprep.subr.bf16.mxu1 %v3617_v6 }
 0x4fa   :  { %3369 = vmatpush3.bf16.msra.mxu1 %v3975_v8 }
 0x4fb   :  { %3370 = vmatprep.subr.bf16.mxu1 %v3617_v6 }
 0x4fd   :  { %2878 = vmatmul.mubr.f32.vlgmr.msra.gmra.mrb[2].mxu1 %v851_v19 }
 0x4fe   :  { %3372 = vmatpush3.bf16.msra.mxu1 %v3371_v59  ;;  %2912 = vmatprep.mubr.msk.f32.mxu1 %vm3618_vm6, %v3616_v3  ;;  %v1547_v59 = vsub.f32 %v56_v17, %v1439_v49 }
 0x4ff   :  { %3373 = vmatprep.subr.bf16.mxu1 %v3617_v6 }
 0x500   :  { %v1548_v34 = vand.u32 4294901760, %v1547_v59 }
 0x502   :  { %3375 = vmatpush3.bf16.msra.mxu1 %v3374_v55  ;;  %v1554_v55 = vsub.f32 %v57_v18, %v1442_v50  ;;  %v1549_v16 = vsub.f32 %v1547_v59, %v1548_v34 }
 0x503   :  { %3376 = vmatprep.subr.bf16.mxu1 %v3617_v6 }
 0x504   :  { %v1550_v24 = vand.u32 4294901760, %v1549_v16 }
 0x506   :  { %3378 = vmatpush3.bf16.msra.mxu1 %v3377_v32  ;;  %v1536_v32 = vand.u32 4294901760, %v1535_v21 }
 0x507   :  { %3379 = vmatprep.subr.bf16.mxu1 %v3617_v6 }
 0x50a   :  { %3381 = vmatpush3.bf16.msra.mxu1 %v3380_v33 }
 0x50b   :  { %3382 = vmatprep.subr.bf16.mxu1 %v3617_v6 }
 0x50e   :  { %3384 = vmatpush3.bf16.msra.mxu1 %v3383_v40  ;;  %v1555_v40 = vand.u32 4294901760, %v1554_v55 }
 0x50f   :  { %3385 = vmatprep.subr.bf16.mxu1 %v3617_v6 }
 0x512   :  { %3387 = vmatpush3.bf16.msra.mxu1 %v3386_v62  ;;  %v1556_v62 = vsub.f32 %v1554_v55, %v1555_v40 }
 0x513   :  { %3388 = vmatprep.subr.bf16.mxu1 %v3617_v6 }
 0x514   :  { %v1557_v37 = vand.u32 4294901760, %v1556_v62 }
 0x516   :  { %3390 = vmatpush3.bf16.msra.mxu1 %v3389_v0  ;;  %v4220_v0 = vpack.c.bf16 %v1557_v37, %v1550_v24 }
 0x517   :  { %3391 = vmatprep.subr.bf16.mxu1 %v3617_v6 }
 0x51a   :  { %3393 = vmatpush3.bf16.msra.mxu1 %v3392_v14 }
 0x51b   :  { %3394 = vmatprep.subr.bf16.mxu1 %v3617_v6 }
 0x51d   :  { %2913 = vmatmul.mubr.f32.vlgmr.msra.gmra.mrb[2].mxu1 %v4070_v23 }
 0x51e   :  { %3396 = vmatpush3.bf16.msra.mxu1 %v3893_v31  ;;  %2947 = vmatprep.mubr.msk.f32.mxu1 %vm3618_vm6, %v3616_v3  ;;  %v50_v31 = vld [vmem:[%s4375_s2 + $0x80] sm:$0xff] }
 0x51f   :  { %3397 = vmatprep.subr.bf16.mxu1 %v3617_v6 }
 0x522   :  { %3399 = vmatpush3.bf16.msra.mxu1 %v3904_v39  ;;  %v51_v39 = vld [vmem:[%s4375_s2 + $0x88] sm:$0xff] }
 0x523   :  { %3400 = vmatprep.subr.bf16.mxu1 %v3617_v6 }
 0x526   :  { %3402 = vmatpush3.bf16.msra.mxu1 %v3923_v43  ;;  %v1421_v43 = vand.u32 4294901760, %v50_v31 }
 0x527   :  { %3403 = vmatprep.subr.bf16.mxu1 %v3617_v6 }
 0x528   :  { %v1505_v27 = vsub.f32 %v50_v31, %v1421_v43  ;;  %v4228_v31 = vpack.c.bf16 %v1554_v55, %v1547_v59 }
 0x52a   :  { %3405 = vmatpush3.bf16.msra.mxu1 %v3927_v44  ;;  %v1424_v44 = vand.u32 4294901760, %v51_v39  ;;  %v1506_v51 = vand.u32 4294901760, %v1505_v27 }
 0x52b   :  { %3406 = vmatprep.subr.bf16.mxu1 %v3617_v6 }
 0x52c   :  { %v1512_v35 = vsub.f32 %v51_v39, %v1424_v44  ;;  %v1507_v54 = vsub.f32 %v1505_v27, %v1506_v51 }
 0x52e   :  { %3408 = vmatpush3.bf16.msra.mxu1 %v3931_v45  ;;  %v4180_v45 = vpack.c.bf16 %v1424_v44, %v1421_v43  ;;  %v1513_v46 = vand.u32 4294901760, %v1512_v35  ;;  %v1508_v22 = vand.u32 4294901760, %v1507_v54  ;;  %v4222_v38 = vpack.c.bf16 %v1512_v35, %v1505_v27 }
 0x52f   :  { %3409 = vmatprep.subr.bf16.mxu1 %v3617_v6 }
 0x530   :  { %3420 = vmatpush3.bf16.msra.mxu0 %v4180_v45  ;;  %v1514_v13 = vsub.f32 %v1512_v35, %v1513_v46  ;;  %v4230_v39 = vpack.c.bf16 %v1513_v46, %v1506_v51 }
 0x531   :  { %3421 = vmatprep.subr.bf16.mxu0 %v3617_v6 }
 0x532   :  { %3411 = vmatpush3.bf16.msra.mxu1 %v3945_v63  ;;  %v52_v63 = vld [vmem:[%s4375_s2 + $0x90] sm:$0xff] }
 0x533   :  { %3412 = vmatprep.subr.bf16.mxu1 %v3617_v6  ;;  %v1427_v2 = vand.u32 4294901760, %v52_v63 }
 0x535   :  { %v1519_v19 = vsub.f32 %v52_v63, %v1427_v2  ;;  %v4236_v63 = vpack.c.bf16 %v1555_v40, %v1548_v34 }
 0x536   :  { %3414 = vmatpush3.bf16.msra.mxu1 %v3955_v53  ;;  %v53_v53 = vld [vmem:[%s4375_s2 + $0x98] sm:$0xff] }
 0x537   :  { %3415 = vmatprep.subr.bf16.mxu1 %v3617_v6  ;;  %v1430_v4 = vand.u32 4294901760, %v53_v53  ;;  %v1520_v47 = vand.u32 4294901760, %v1519_v19 }
 0x539   :  { %v4190_v5 = vpack.c.bf16 %v1430_v4, %v1427_v2  ;;  %v1526_v20 = vsub.f32 %v53_v53, %v1430_v4  ;;  %v1521_v57 = vsub.f32 %v1519_v19, %v1520_v47  ;;  %v766_v53 = vsub.s32 1, %v3833_v25 }
 0x53a   :  { %3417 = vmatpush3.bf16.msra.mxu1 %v3975_v8  ;;  %v55_v8 = vld [vmem:[%s4375_s2 + $0xa8] sm:$0xff] }
 0x53b   :  { %3423 = vmatpush3.bf16.msra.mxu0 %v4190_v5  ;;  %v1436_v11 = vand.u32 4294901760, %v55_v8  ;;  %v1527_v9 = vand.u32 4294901760, %v1526_v20  ;;  %v1522_v60 = vand.u32 4294901760, %v1521_v57  ;;  %v4224_v42 = vpack.c.bf16 %v1526_v20, %v1519_v19 }
 0x53c   :  { %3424 = vmatprep.subr.bf16.mxu0 %v3617_v6  ;;  %v767_v2 = vrot.slane %v3841_v36, %v766_v53 }
 0x53d   :  { %2948 = vmatmul.mubr.f32.vlgmr.msra.gmra.mrb[2].mxu1 %v4070_v23  ;;  %v4200_v15 = vpack.c.bf16 %v1436_v11, %v1433_v10  ;;  %v1515_v23 = vand.u32 4294901760, %v1514_v13  ;;  %v1528_v29 = vsub.f32 %v1526_v20, %v1527_v9  ;;  %v1540_v48 = vsub.f32 %v55_v8, %v1436_v11 }
 0x53e   :  { %v4232_v43 = vpack.c.bf16 %v1527_v9, %v1520_v47 }
 0x53f   :  { %3426 = vmatpush3.bf16.msra.mxu0 %v4200_v15  ;;  %v4214_v56 = vpack.c.bf16 %v1515_v23, %v1508_v22  ;;  %v1529_v61 = vand.u32 4294901760, %v1528_v29  ;;  %v1541_v58 = vand.u32 4294901760, %v1540_v48  ;;  %v4226_v14 = vpack.c.bf16 %v1540_v48, %v1533_v30 }
 0x540   :  { %3427 = vmatprep.subr.bf16.mxu0 %v3617_v6 }
 0x541   :  { %v4216_v12 = vpack.c.bf16 %v1529_v61, %v1522_v60  ;;  %v1542_v26 = vsub.f32 %v1540_v48, %v1541_v58  ;;  %v4234_v44 = vpack.c.bf16 %v1541_v58, %v1534_v1 }
 0x543   :  { %3429 = vmatpush3.bf16.msra.mxu0 %v4210_v52  ;;  %v1543_v33 = vand.u32 4294901760, %v1542_v26 }
 0x544   :  { %3430 = vmatprep.subr.bf16.mxu0 %v3617_v6 }
 0x545   :  { %v4218_v41 = vpack.c.bf16 %v1543_v33, %v1536_v32  ;;  %v2522_v33 = vsub.s32 3, %v3833_v25 }
 0x610   :  { %v1405_v4 = vpop.f32.mrb[2].mxu1 }
 0x611   :  { %v4240_v7 = vadd.f32 %v1405_v4, %v767_v2  ;;  %v2949_v8 = vpop.f32.mrb[3].mxu1 }
 0x613   :  { %v1410_v10 = vsel %vm1409_vm8, %v4240_v7, 0.0 }
 0x614   :  { %v1411_v11 = vrot.slane %v1410_v10, 4 }
 0x616   :  { %v1412_v27 = vadd.f32 %v1411_v11, %v1410_v10 }
 0x618   :  { %v1413_v35 = vrot.slane %v1412_v27, 2 }
 0x61a   :  { %v1414_v17 = vadd.f32 %v1413_v35, %v1412_v27 }
 0x61c   :  { %v1415_v18 = vrot.slane %v1414_v17, 1 }
 0x61e   :  { %v1416_v49 = vadd.f32 %v1415_v18, %v1414_v17 }
 0x620   :  { %v1418_v50 = vsel %vm78_vm0, %v1416_v49, 0 }
 0x621   :  { %v1493_v51 = vand.u32 4294901760, %v1418_v50 }
 0x623   :  { %v1494_v46 = vsub.f32 %v1418_v50, %v1493_v51 }
 0x625   :  { %v1495_v54 = vand.u32 4294901760, %v1494_v46 }
 0x627   :  { %v1496_v36 = vsub.f32 %v1494_v46, %v1495_v54 }
 0x629   :  { %v1497_v13 = vand.u32 4294901760, %v1496_v36 }
 0x62b   :  { %2967 = vmatmul.mubr.f32.vlgmr.msra.gmra.mrb[2].mxu0 %v1497_v13 }
 0x62c   :  { %3432 = vmatpush3.bf16.msra.mxu0 %v4214_v56  ;;  %2985 = vmatprep.mubr.msk.f32.mxu0 %vm3618_vm6, %v3616_v3 }
 0x62d   :  { %3433 = vmatprep.subr.bf16.mxu0 %v3617_v6 }
 0x630   :  { %3435 = vmatpush3.bf16.msra.mxu0 %v4216_v12 }
 0x631   :  { %3436 = vmatprep.subr.bf16.mxu0 %v3617_v6 }
 0x634   :  { %3438 = vmatpush3.bf16.msra.mxu0 %v4218_v41 }
 0x635   :  { %3439 = vmatprep.subr.bf16.mxu0 %v3617_v6 }
 0x638   :  { %3441 = vmatpush3.bf16.msra.mxu0 %v4220_v0 }
 0x639   :  { %3442 = vmatprep.subr.bf16.mxu0 %v3617_v6 }
 0x63b   :  { %2986 = vmatmul.mubr.f32.vlgmr.msra.gmra.mrb[2].mxu0 %v1493_v51 }
 0x63c   :  { %3444 = vmatpush3.bf16.msra.mxu0 %v4222_v38  ;;  %3004 = vmatprep.mubr.msk.f32.mxu0 %vm3618_vm6, %v3616_v3 }
 0x63d   :  { %3445 = vmatprep.subr.bf16.mxu0 %v3617_v6 }
 0x640   :  { %3447 = vmatpush3.bf16.msra.mxu0 %v4224_v42 }
 0x641   :  { %3448 = vmatprep.subr.bf16.mxu0 %v3617_v6 }
 0x644   :  { %3450 = vmatpush3.bf16.msra.mxu0 %v4226_v14 }
 0x645   :  { %3451 = vmatprep.subr.bf16.mxu0 %v3617_v6 }
 0x648   :  { %3453 = vmatpush3.bf16.msra.mxu0 %v4228_v31 }
 0x649   :  { %3454 = vmatprep.subr.bf16.mxu0 %v3617_v6 }
 0x64b   :  { %3005 = vmatmul.mubr.f32.vlgmr.msra.gmra.mrb[2].mxu0 %v1494_v46 }
 0x64c   :  { %3456 = vmatpush3.bf16.msra.mxu0 %v4180_v45  ;;  %3023 = vmatprep.mubr.msk.f32.mxu0 %vm3618_vm6, %v3616_v3 }
 0x64d   :  { %3457 = vmatprep.subr.bf16.mxu0 %v3617_v6 }
 0x650   :  { %3459 = vmatpush3.bf16.msra.mxu0 %v4190_v5 }
 0x651   :  { %3460 = vmatprep.subr.bf16.mxu0 %v3617_v6 }
 0x654   :  { %3462 = vmatpush3.bf16.msra.mxu0 %v4200_v15 }
 0x655   :  { %3463 = vmatprep.subr.bf16.mxu0 %v3617_v6 }
 0x658   :  { %3465 = vmatpush3.bf16.msra.mxu0 %v4210_v52 }
 0x659   :  { %3466 = vmatprep.subr.bf16.mxu0 %v3617_v6 }
 0x65b   :  { %3024 = vmatmul.mubr.f32.vlgmr.msra.gmra.mrb[2].mxu0 %v1495_v54 }
 0x65c   :  { %3468 = vmatpush3.bf16.msra.mxu0 %v4230_v39  ;;  %3042 = vmatprep.mubr.msk.f32.mxu0 %vm3618_vm6, %v3616_v3 }
 0x65d   :  { %3469 = vmatprep.subr.bf16.mxu0 %v3617_v6 }
 0x660   :  { %3471 = vmatpush3.bf16.msra.mxu0 %v4232_v43 }
 0x661   :  { %3472 = vmatprep.subr.bf16.mxu0 %v3617_v6 }
 0x664   :  { %3474 = vmatpush3.bf16.msra.mxu0 %v4234_v44 }
 0x665   :  { %3475 = vmatprep.subr.bf16.mxu0 %v3617_v6 }
 0x668   :  { %3477 = vmatpush3.bf16.msra.mxu0 %v4236_v63 }
 0x669   :  { %3478 = vmatprep.subr.bf16.mxu0 %v3617_v6 }
 0x66b   :  { %3043 = vmatmul.mubr.f32.vlgmr.msra.gmra.mrb[2].mxu0 %v1493_v51 }
 0x66c   :  { %3480 = vmatpush3.bf16.msra.mxu0 %v4180_v45  ;;  %3061 = vmatprep.mubr.msk.f32.mxu0 %vm3618_vm6, %v3616_v3 }
 0x66d   :  { %3481 = vmatprep.subr.bf16.mxu0 %v3617_v6 }
 0x670   :  { %3483 = vmatpush3.bf16.msra.mxu0 %v4190_v5 }
 0x671   :  { %3484 = vmatprep.subr.bf16.mxu0 %v3617_v6 }
 0x674   :  { %3486 = vmatpush3.bf16.msra.mxu0 %v4200_v15 }
 0x675   :  { %3487 = vmatprep.subr.bf16.mxu0 %v3617_v6 }
 0x678   :  { %3489 = vmatpush3.bf16.msra.mxu0 %v4210_v52 }
 0x679   :  { %3490 = vmatprep.subr.bf16.mxu0 %v3617_v6 }
 0x67b   :  { %3062 = vmatmul.mubr.f32.vlgmr.msra.gmra.mrb[2].mxu0 %v1493_v51 }
 0x67c   :  { %3492 = vmatpush3.bf16.msra.mxu0 %v4180_v45  ;;  %3080 = vmatprep.mubr.msk.f32.mxu0 %vm3618_vm6, %v3616_v3 }
 0x67d   :  { %3493 = vmatprep.subr.bf16.mxu0 %v3617_v6 }
 0x680   :  { %3495 = vmatpush3.bf16.msra.mxu0 %v4190_v5 }
 0x681   :  { %3496 = vmatprep.subr.bf16.mxu0 %v3617_v6 }
 0x684   :  { %3498 = vmatpush3.bf16.msra.mxu0 %v4200_v15 }
 0x685   :  { %3499 = vmatprep.subr.bf16.mxu0 %v3617_v6 }
 0x688   :  { %3501 = vmatpush3.bf16.msra.mxu0 %v4210_v52 }
 0x689   :  { %3502 = vmatprep.subr.bf16.mxu0 %v3617_v6 }
 0x74e   :  { %v1953_v19 = vpop.f32.mrb[2].mxu0 }
 0x74f   :  { %v1960_v20 = vrot.slane %v1953_v19, %v3836_v28  ;;  %v3063_v22 = vpop.f32.mrb[3].mxu0 }
 0x751   :  { %v4307_v23 = vsub.f32 %v4240_v7, %v1960_v20 }
 0x753   :  { %v1962_v47 = vmul.f32 %v4307_v23, %v4307_v23 }
 0x755   :  { %v1963_v9 = vsel %vm1409_vm8, %v1962_v47, 0.0 }
 0x756   :  { %v1964_v57 = vrot.slane %v1963_v9, 4 }
 0x758   :  { %v1965_v29 = vadd.f32 %v1964_v57, %v1963_v9 }
 0x75a   :  { %v1966_v30 = vrot.slane %v1965_v29, 2 }
 0x75c   :  { %v1967_v48 = vadd.f32 %v1966_v30, %v1965_v29 }
 0x75e   :  { %v1968_v60 = vrot.slane %v1967_v48, 1 }
 0x760   :  { %v1969_v61 = vadd.f32 %v1968_v60, %v1967_v48 }
 0x762   :  { %v1971_v1 = vsel %vm78_vm0, %v1969_v61, 0 }
 0x763   :  { %v2046_v58 = vand.u32 4294901760, %v1971_v1 }
 0x765   :  { %v2047_v21 = vsub.f32 %v1971_v1, %v2046_v58 }
 0x767   :  { %v2048_v28 = vand.u32 4294901760, %v2047_v21 }
 0x769   :  { %v2049_v26 = vsub.f32 %v2047_v21, %v2048_v28 }
 0x76b   :  { %v2050_v59 = vand.u32 4294901760, %v2049_v26 }
 0x76d   :  { %3081 = vmatmul.mubr.f32.vlgmr.msra.gmra.mrb[4].mxu0 %v2050_v59 }
 0x76e   :  { %3504 = vmatpush3.bf16.msra.mxu0 %v4214_v56  ;;  %3099 = vmatprep.mubr.msk.f32.mxu0 %vm3618_vm6, %v3616_v3 }
 0x76f   :  { %3505 = vmatprep.subr.bf16.mxu0 %v3617_v6 }
 0x772   :  { %3507 = vmatpush3.bf16.msra.mxu0 %v4216_v12 }
 0x773   :  { %3508 = vmatprep.subr.bf16.mxu0 %v3617_v6 }
 0x776   :  { %3510 = vmatpush3.bf16.msra.mxu0 %v4218_v41 }
 0x777   :  { %3511 = vmatprep.subr.bf16.mxu0 %v3617_v6 }
 0x77a   :  { %3513 = vmatpush3.bf16.msra.mxu0 %v4220_v0 }
 0x77b   :  { %3514 = vmatprep.subr.bf16.mxu0 %v3617_v6 }
 0x77d   :  { %3100 = vmatmul.mubr.f32.vlgmr.msra.gmra.mrb[4].mxu0 %v2046_v58 }
 0x77e   :  { %3516 = vmatpush3.bf16.msra.mxu0 %v4222_v38  ;;  %3118 = vmatprep.mubr.msk.f32.mxu0 %vm3618_vm6, %v3616_v3 }
 0x77f   :  { %3517 = vmatprep.subr.bf16.mxu0 %v3617_v6 }
 0x782   :  { %3519 = vmatpush3.bf16.msra.mxu0 %v4224_v42 }
 0x783   :  { %3520 = vmatprep.subr.bf16.mxu0 %v3617_v6 }
 0x786   :  { %3522 = vmatpush3.bf16.msra.mxu0 %v4226_v14 }
 0x787   :  { %3523 = vmatprep.subr.bf16.mxu0 %v3617_v6 }
 0x78a   :  { %3525 = vmatpush3.bf16.msra.mxu0 %v4228_v31 }
 0x78b   :  { %3526 = vmatprep.subr.bf16.mxu0 %v3617_v6 }
 0x78d   :  { %3119 = vmatmul.mubr.f32.vlgmr.msra.gmra.mrb[4].mxu0 %v2047_v21 }
 0x78e   :  { %3528 = vmatpush3.bf16.msra.mxu0 %v4180_v45  ;;  %3137 = vmatprep.mubr.msk.f32.mxu0 %vm3618_vm6, %v3616_v3 }
 0x78f   :  { %3529 = vmatprep.subr.bf16.mxu0 %v3617_v6 }
 0x792   :  { %3531 = vmatpush3.bf16.msra.mxu0 %v4190_v5 }
 0x793   :  { %3532 = vmatprep.subr.bf16.mxu0 %v3617_v6 }
 0x796   :  { %3534 = vmatpush3.bf16.msra.mxu0 %v4200_v15 }
 0x797   :  { %3535 = vmatprep.subr.bf16.mxu0 %v3617_v6 }
 0x79a   :  { %3537 = vmatpush3.bf16.msra.mxu0 %v4210_v52 }
 0x79b   :  { %3538 = vmatprep.subr.bf16.mxu0 %v3617_v6 }
 0x79d   :  { %3138 = vmatmul.mubr.f32.vlgmr.msra.gmra.mrb[4].mxu0 %v2048_v28 }
 0x79e   :  { %3540 = vmatpush3.bf16.msra.mxu0 %v4230_v39  ;;  %3156 = vmatprep.mubr.msk.f32.mxu0 %vm3618_vm6, %v3616_v3 }
 0x79f   :  { %3541 = vmatprep.subr.bf16.mxu0 %v3617_v6 }
 0x7a2   :  { %3543 = vmatpush3.bf16.msra.mxu0 %v4232_v43 }
 0x7a3   :  { %3544 = vmatprep.subr.bf16.mxu0 %v3617_v6 }
 0x7a6   :  { %3546 = vmatpush3.bf16.msra.mxu0 %v4234_v44 }
 0x7a7   :  { %3547 = vmatprep.subr.bf16.mxu0 %v3617_v6 }
 0x7aa   :  { %3549 = vmatpush3.bf16.msra.mxu0 %v4236_v63 }
 0x7ab   :  { %3550 = vmatprep.subr.bf16.mxu0 %v3617_v6 }
 0x7ad   :  { %3157 = vmatmul.mubr.f32.vlgmr.msra.gmra.mrb[4].mxu0 %v2046_v58 }
 0x7ae   :  { %3552 = vmatpush3.bf16.msra.mxu0 %v4180_v45  ;;  %3175 = vmatprep.mubr.msk.f32.mxu0 %vm3618_vm6, %v3616_v3  ;;  %v2517_v3 = vsub.s32 2, %v3833_v25 }
 0x7af   :  { %3553 = vmatprep.subr.bf16.mxu0 %v3617_v6 }
 0x7b2   :  { %3555 = vmatpush3.bf16.msra.mxu0 %v4190_v5  ;;  %v3615_v5 = vld [vmem:[%s4374_s3] sm:$0xff] }
 0x7b3   :  { %3556 = vmatprep.subr.bf16.mxu0 %v3617_v6 }
 0x7b6   :  { %3558 = vmatpush3.bf16.msra.mxu0 %v4200_v15 }
 0x7b7   :  { %3559 = vmatprep.subr.bf16.mxu0 %v3617_v6  ;;  %v2523_v6 = vrot.slane %v3615_v5, %v2522_v33 }
 0x7ba   :  { %3561 = vmatpush3.bf16.msra.mxu0 %v4210_v52 }
 0x7bd   :  { %3176 = vmatmul.mubr.f32.vlgmr.msra.gmra.mrb[4].mxu0 %v2046_v58 }
 0x890   :  { %v2506_v56 = vpop.f32.mrb[4].mxu0 }
 0x891   :  { %v3567_v12 = vadd.f32 1e-05, %v2506_v56  ;;  %v3177_v55 = vpop.f32.mrb[5].mxu0 }
 0x893   :  { %3613 = vrsqrt.f32 %v3567_v12 }
 0x89d   :  { %v3614_v45 = vpop.eup %3613 }
 0x89e   :  { %v2512_v32 = vrot.slane %v3614_v45, 6 }
 0x8a0   :  { %v2514_v15 = vmul.f32 %v3615_v5, %v2512_v32 }
 0x8a2   :  { %v2518_v34 = vrot.slane %v2514_v15, %v2517_v3 }
 0x8a4   :  { %v2519_v52 = vmul.f32 %v2518_v34, %v4307_v23 }
 0x8a6   :  { %v2524_v40 = vadd.f32 %v2523_v6, %v2519_v52 }
 0x8a8   :  { %2525 = vst.msk [vmem:[%s4376_s4] sm:$0x3] %vm1409_vm8, %v2524_v40 }

</bundles_post_ra>
